<compile_context>
chip_gen: v5e
topology: v5e:2x2
jax: 0.10.0
libtpu: 0.0.40
codegen_flags: <defaults>
</compile_context>

<pallas_src>
import functools

import jax
import jax.numpy as jnp
from jax import lax
from jax.experimental import pallas as pl
from jax.experimental.pallas import tpu as pltpu

_LANE = 128
_SUBLANE = 8


def _round_up(v, m):
    return pl.cdiv(v, m) * m


def _vmem_budget_bytes(override=None):
    if override is not None:
        return int(override)
    try:
        cap = int(pltpu.get_tpu_info().vmem_capacity_bytes)
    except Exception:
        cap = 0
    if cap <= 0:
        cap = 64 * 1024 * 1024          # v7x physical size: safe floor everywhere
    budget = (cap * 3) // 4             # ~96 MiB on v5e/v6e, ~48 MiB on v7x
    return int(max(24 * 1024 * 1024, min(budget, 112 * 1024 * 1024)))


def _graphconv_kernel(*refs, scale_identity, project_first, row_tiled):
    if row_tiled:
        theta_ref, dhr_ref, x_ref, a_ref, w_ref, b_ref, out_ref, fs_ref = refs
    else:
        theta_ref, x_ref, a_ref, w_ref, b_ref, out_ref = refs

    theta = theta_ref[0]
    c = jnp.float32(10.0 if scale_identity else 1.0)
    eps = jnp.float32(1e-5)

    A = a_ref[...]                        # (Bt, tile_n, N_p), caller's dtype
    Bt, tile_n, N_p = A.shape
    mxu_dtype = A.dtype                   # stream A's dtype straight into the MXU

    def project(f):                       # f @ W^T, lane-dense width, f32 accumulate
        bsz, rows, width = f.shape
        flat = f.reshape(bsz * rows, width).astype(w_ref.dtype)
        y = jnp.dot(flat, w_ref[...], preferred_element_type=jnp.float32)
        return y.reshape(bsz, rows, y.shape[-1])

    if row_tiled:
        # fs = D_hat @ feat over all N stays resident in scratch; built once per
        # batch block (x was pre-scaled by D_hat in the wrapper, D_hat hoisted).
        nt = pl.program_id(1)

        @pl.when(nt == 0)
        def _():
            xs = x_ref[...]               # (Bt, N_p, F_in_p) f32, already D_hat-scaled
            fs_ref[...] = project(xs) if project_first else xs.astype(jnp.float32)

        fs = fs_ref[...]                                  # (Bt, N_p, F_p) f32
        row0 = pl.multiple_of(nt * tile_n, tile_n)
        fs_rows = fs_ref[:, pl.ds(row0, tile_n), :]       # (Bt, tile_n, F_p)
        dh_rows = dhr_ref[...]                            # (Bt, tile_n, 1) f32
    else:
        # Column sums of A on the MXU (ones @ A): avoids an f32 copy of A and
        # a VPU/XLU reduction over N^2 elements.  sum(A_hat,1) = theta*colsum + c.
        ones = jnp.ones((Bt, 8, N_p), dtype=mxu_dtype)
        colsum = jnp.einsum("bkn,bnm->bkm", ones, A,
                            preferred_element_type=jnp.float32)[:, 0, :]   # (Bt, N_p)
        d_hat = lax.rsqrt(theta * colsum + c + eps)       # (Bt, N_p) f32
        dh_col = d_hat[:, :, None]                        # (Bt, N_p, 1)
        x = x_ref[...]
        feat = project(x) if project_first else x.astype(jnp.float32)
        fs = dh_col * feat                                # D_hat @ feat, f32
        fs_rows = fs
        dh_rows = dh_col

    # Rows of L @ feat without materializing eye / A_hat / L:
    #   D_rows * (theta * (A_rows @ (D feat)) + c * (D feat)_rows)
    af = jnp.einsum("bnm,bmf->bnf", A, fs.astype(mxu_dtype),
                    preferred_element_type=jnp.float32)   # (Bt, tile_n, F_p) f32
    lfeat = dh_rows * (theta * af + c * fs_rows)

    y = lfeat if project_first else project(lfeat)        # (Bt, tile_n, F_out_p)
    y = y + b_ref[...][None]                               # (1, 1, F_out_p) broadcast
    # TODO(synk): activation is None in the reference config; apply it here if set.
    out_ref[...] = y.astype(out_ref.dtype)


def graph_conv(x, A, weight, bias, log_theta, *, scale_identity=False,
               block_b=None, block_n=None, vmem_budget_bytes=None):
    """x: (B, N, F_in), A: (B, N, N), weight: (F_out, F_in), bias: (F_out,),
    log_theta: (1,).  Returns (out: (B, N, F_out), A) like the torch module."""
    B, N, F_in = x.shape
    F_out = weight.shape[0]
    out_dtype = jnp.promote_types(x.dtype, weight.dtype)

    # Lane-pad both feature widths; pick the matmul order on padded widths
    # (ties go to project-first so the propagated slab is F_out_p wide).
    F_in_p = _round_up(F_in, _LANE)
    F_out_p = _round_up(F_out, _LANE)
    project_first = F_out_p <= F_in_p
    F_p = F_out_p if project_first else F_in_p

    budget = _vmem_budget_bytes(vmem_budget_bytes)

    x_is = 4                                     # x is f32-scaled in row-tiled mode (conservative)
    a_is = jnp.dtype(A.dtype).itemsize
    w_is = jnp.dtype(weight.dtype).itemsize
    o_is = jnp.dtype(out_dtype).itemsize

    w_block_bytes = F_in_p * F_out_p * w_is
    w_bufs = 1 if 2 * w_block_bytes > budget // 8 else 2   # single-buffer big constant weights

    def step_bytes(bt, tn, np_):
        """Per-grid-step VMEM: double-buffered pipeline blocks + f32 intermediates
        + scratch, with lane dims rounded up to 128."""
        n_lane = _round_up(np_, _LANE)
        tiled = tn < np_
        sz = 2 * bt * np_ * F_in_p * x_is            # x block (full N, resident)
        sz += 2 * bt * tn * n_lane * a_is            # A row tile
        sz += 2 * bt * tn * F_out_p * o_is           # out tile
        sz += w_bufs * w_block_bytes                 # W^T
        sz += 2 * _LANE * 4                          # bias
        sz += 3 * bt * np_ * F_p * 4                 # feat / fs build intermediates (f32)
        sz += 4 * bt * tn * max(F_p, F_out_p) * 4    # af / lfeat / y + slack (f32)
        if tiled:
            sz += bt * np_ * F_p * 4                 # fs scratch (single buffer)
            sz += 2 * bt * tn * _LANE * 4            # D_hat row block (lane padded)
        else:
            sz += bt * 9 * n_lane * 4                # ones@A colsum + d_hat
        return sz

    # ---- choose the N-row tile ----
    N_p = _round_up(N, _SUBLANE)
    if block_n is not None:
        tile_n = max(_SUBLANE, min(_round_up(int(block_n), _SUBLANE), N_p))
    else:
        tile_n = N_p
        while tile_n > _SUBLANE and step_bytes(1, tile_n, N_p) > budget:
            tile_n = _round_up(max(tile_n // 2, _SUBLANE), _SUBLANE)
        # TODO(synk): if even tile_n == 8 does not fit (resident x / fs slabs too
        # big for extreme N), a further column tiling of fs would be required.
    if tile_n < N_p:
        N_p = _round_up(N, tile_n)           # make the row tile divide the padded N
    n_tiles = N_p // tile_n
    row_tiled = n_tiles > 1

    # ---- choose the batch block ----
    if block_b is not None:
        Bt = max(1, min(int(block_b), B))
    else:
        # Keep >= 2 steps on the "parallel" batch axis so v7x's two TensorCores
        # both get work, then grow Bt while a step fits the VMEM budget.
        bt_cap = B if B < 2 else pl.cdiv(B, 2)
        feasible = 1
        while feasible < bt_cap and step_bytes(feasible + 1, tile_n, N_p) <= budget:
            feasible += 1
        Bt, best_pad = 1, None
        for bt in range(feasible, 0, -1):    # prefer big blocks but avoid batch-pad waste
            padded = _round_up(B, bt)
            if best_pad is None or padded < best_pad:
                Bt, best_pad = bt, padded
    B_pad = _round_up(B, Bt)

    # ---- padded operands ----
    Ap = jnp.pad(A, ((0, B_pad - B), (0, N_p - N), (0, N_p - N)))
    xp = jnp.pad(x, ((0, B_pad - B), (0, N_p - N), (0, F_in_p - F_in)))
    w_t = jnp.pad(jnp.transpose(weight), ((0, F_in_p - F_in), (0, F_out_p - F_out)))
    b_pad = jnp.pad(bias.astype(jnp.float32), (0, F_out_p - F_out)).reshape(1, F_out_p)
    theta = jnp.exp(log_theta.astype(jnp.float32)).reshape(1)

    w_kwargs = {"pipeline_mode": pl.Buffered(1)} if w_bufs == 1 else {}
    theta_spec = pl.BlockSpec(memory_space=pltpu.MemorySpace.SMEM)
    x_spec = pl.BlockSpec((Bt, N_p, F_in_p), lambda b, n: (b, 0, 0))
    a_spec = pl.BlockSpec((Bt, tile_n, N_p), lambda b, n: (b, n, 0))
    w_spec = pl.BlockSpec((F_in_p, F_out_p), lambda b, n: (0, 0), **w_kwargs)
    bias_spec = pl.BlockSpec((1, F_out_p), lambda b, n: (0, 0))
    out_spec = pl.BlockSpec((Bt, tile_n, F_out_p), lambda b, n: (b, n, 0))

    if row_tiled:
        # A row tile cannot see full column sums -> hoist D_hat to a cheap XLA
        # pre-pass and fold it into x so fs is built from x alone in-kernel.
        c = jnp.float32(10.0 if scale_identity else 1.0)
        colsum = jnp.sum(Ap.astype(jnp.float32), axis=1)                  # (B_pad, N_p)
        d_hat = lax.rsqrt(theta[0] * colsum + c + jnp.float32(1e-5))
        xp = d_hat[:, :, None] * xp.astype(jnp.float32)                   # pre-scaled x (f32)
        dh_rows = d_hat[:, :, None]                                       # (B_pad, N_p, 1)
        inputs = (theta, dh_rows, xp, Ap, w_t, b_pad)
        in_specs = [theta_spec,
                    pl.BlockSpec((Bt, tile_n, 1), lambda b, n: (b, n, 0)),
                    x_spec, a_spec, w_spec, bias_spec]
        scratch_shapes = [pltpu.VMEM((Bt, N_p, F_p), jnp.float32)]
    else:
        inputs = (theta, xp, Ap, w_t, b_pad)
        in_specs = [theta_spec, x_spec, a_spec, w_spec, bias_spec]
        scratch_shapes = []

    kernel = functools.partial(_graphconv_kernel,
                               scale_identity=scale_identity,
                               project_first=project_first,
                               row_tiled=row_tiled)

    out_p = pl.pallas_call(
        kernel,
        out_shape=jax.ShapeDtypeStruct((B_pad, N_p, F_out_p), out_dtype),
        grid=(B_pad // Bt, n_tiles),
        in_specs=in_specs,
        out_specs=out_spec,
        scratch_shapes=scratch_shapes,
        compiler_params=pltpu.CompilerParams(
            dimension_semantics=("parallel", "arbitrary"),
            vmem_limit_bytes=int(budget)),
    )(*inputs)

    out = out_p[:B, :N, :F_out]
    return out, A


def _reference(x, A, weight, bias, log_theta, *, scale_identity=False):
    theta = jnp.exp(log_theta)[0]
    N = A.shape[1]
    eye = jnp.eye(N, dtype=jnp.float32)[None]
    if scale_identity:
        eye = 10.0 * eye
    A_hat = theta * A.astype(jnp.float32) + eye
    D_hat = (jnp.sum(A_hat, axis=1) + 1e-5) ** (-0.5)
    L = D_hat[:, :, None] * A_hat * D_hat[:, None, :]
    return jnp.einsum("bnm,bmf->bnf", L, x.astype(jnp.float32)) @ weight.T + bias


if __name__ == "__main__":
    key = jax.random.PRNGKey(0)
    k1, k2, k3, k4, k5 = jax.random.split(key, 5)

    B, N, F_in, F_out = 2, 16, 8, 32

    x = jax.random.normal(k1, (B, N, F_in), dtype=jnp.float32)
    # Symmetric-ish non-negative adjacency with no self loops.
    A_raw = jax.random.uniform(k2, (B, N, N), dtype=jnp.float32)
    A = (A_raw + jnp.swapaxes(A_raw, 1, 2)) * 0.5
    A = A * (1.0 - jnp.eye(N, dtype=jnp.float32)[None])

    # nn.Linear(in_features=F_in, out_features=F_out) parameters.
    weight = jax.random.normal(k3, (F_out, F_in), dtype=jnp.float32) * 0.1
    bias = jax.random.normal(k4, (F_out,), dtype=jnp.float32) * 0.1
    # nn.Parameter(torch.randn(1))
    log_theta = jax.random.normal(k5, (1,), dtype=jnp.float32)

    ref = _reference(x, A, weight, bias, log_theta)

    # 1) default path: project-first, auto tiling, in-kernel D_hat on the MXU.
    out, A_out = graph_conv(x, A, weight, bias, log_theta)
    out = jax.block_until_ready(out)
    assert out.shape == (B, N, F_out)
    assert jnp.allclose(out, ref, atol=1e-4, rtol=1e-4), "mismatch vs reference"

    # 2) propagate-first branch (wide F_out) + scale_identity=True.
    F_out2 = 160
    w2 = jax.random.normal(k3, (F_out2, F_in), dtype=jnp.float32) * 0.1
    b2 = jax.random.normal(k4, (F_out2,), dtype=jnp.float32) * 0.1
    out2, _ = graph_conv(x, A, w2, b2, log_theta, scale_identity=True)
    out2 = jax.block_until_ready(out2)
    ref2 = _reference(x, A, w2, b2, log_theta, scale_identity=True)
    assert jnp.allclose(out2, ref2, atol=1e-4, rtol=1e-4), "mismatch (propagate-first)"

    # 3) forced N-row tiling: exercises the large-N / hoisted-D_hat / fs-scratch path.
    out3, _ = graph_conv(x, A, weight, bias, log_theta, block_n=8, block_b=1)
    out3 = jax.block_until_ready(out3)
    assert jnp.allclose(out3, ref, atol=1e-4, rtol=1e-4), "mismatch (row-tiled)"

    # 4) A streamed in bf16 (halves the dominant HBM traffic); looser tolerance
    #    for the documented bf16-MXU precision tradeoff.
    out4, _ = graph_conv(x, A.astype(jnp.bfloat16), weight, bias, log_theta)
    out4 = jax.block_until_ready(out4)
    assert jnp.allclose(out4, ref, atol=5e-2, rtol=5e-2), "mismatch (bf16 A)"

    print("KERNEL_OK")
</pallas_src>

<mosaic_0001>
module attributes {stable_mosaic.version = 11 : i64} {
  func.func @_graphconv_kernel(%arg0: i32, %arg1: i32, %arg2: memref<1xf32, #tpu.memory_space<smem>>, %arg3: memref<1x16x128xf32, #tpu.memory_space<vmem>>, %arg4: memref<1x16x16xf32, #tpu.memory_space<vmem>>, %arg5: memref<128x128xf32, #tpu.memory_space<vmem>>, %arg6: memref<1x128xf32, #tpu.memory_space<vmem>>, %arg7: memref<1x16x128xf32, #tpu.memory_space<vmem>>) attributes {dimension_semantics = [#tpu.dimension_semantics<parallel>, #tpu.dimension_semantics<arbitrary>], iteration_bounds = array<i64: 2, 1>, scalar_prefetch = 0 : i64, scratch_operands = 0 : i64, tpu.core_type = #tpu.core_type<tc>, window_params = [{transform_indices = @transform_0, window_bounds = array<i64: 1>}, {transform_indices = @transform_1, window_bounds = array<i64: 1, 16, 128>}, {transform_indices = @transform_2, window_bounds = array<i64: 1, 16, 16>}, {pipeline_mode = #tpu.pipeline_mode<synchronous>, transform_indices = @transform_3, window_bounds = array<i64: 128, 128>}, {pipeline_mode = #tpu.pipeline_mode<synchronous>, transform_indices = @transform_4, window_bounds = array<i64: 1, 128>}, {transform_indices = @transform_5, window_bounds = array<i64: 1, 16, 128>}]} {
    %c0 = arith.constant 0 : index
    %0 = memref.load %arg2[%c0] : memref<1xf32, #tpu.memory_space<smem>>
    %c0_0 = arith.constant 0 : index
    %c0_1 = arith.constant 0 : index
    %c0_2 = arith.constant 0 : index
    %1 = vector.load %arg4[%c0_0, %c0_1, %c0_2] : memref<1x16x16xf32, #tpu.memory_space<vmem>>, vector<1x16x16xf32>
    %cst = arith.constant 1.000000e+00 : f32
    %2 = vector.broadcast %cst : f32 to vector<1x8x16xf32>
    "tpu.trace_start"() <{level = 10 : i32, message = "bkn,bnm->bkm"}> : () -> ()
    %cst_3 = arith.constant dense<0.000000e+00> : vector<1x8x16xf32>
    %3 = tpu.matmul %2, %1, %cst_3 {dimension_numbers = #tpu.dot_dimension_numbers<[2], [1], [1], [2], [0, 0, 0, 1, 1, 2], [0], [0]>} : vector<1x8x16xf32>, vector<1x16x16xf32>, vector<1x8x16xf32> -> vector<1x8x16xf32>
    "tpu.trace_stop"() : () -> ()
    %4 = vector.extract_strided_slice %3 {offsets = [0, 0, 0], sizes = [1, 1, 16], strides = [1, 1, 1]} : vector<1x8x16xf32> to vector<1x1x16xf32>
    %5 = vector.shape_cast %4 : vector<1x1x16xf32> to vector<1x16xf32>
    %6 = vector.broadcast %0 : f32 to vector<1x16xf32>
    %7 = arith.mulf %6, %5 : vector<1x16xf32>
    %cst_4 = arith.constant 1.000000e+00 : f32
    %8 = vector.broadcast %cst_4 : f32 to vector<1x16xf32>
    %9 = arith.addf %7, %8 : vector<1x16xf32>
    %cst_5 = arith.constant 9.99999974E-6 : f32
    %10 = vector.broadcast %cst_5 : f32 to vector<1x16xf32>
    %11 = arith.addf %9, %10 : vector<1x16xf32>
    %12 = math.rsqrt %11 : vector<1x16xf32>
    %13 = vector.shape_cast %12 : vector<1x16xf32> to vector<1x16x1xf32>
    %c0_6 = arith.constant 0 : index
    %c0_7 = arith.constant 0 : index
    %c0_8 = arith.constant 0 : index
    %14 = vector.load %arg3[%c0_6, %c0_7, %c0_8] : memref<1x16x128xf32, #tpu.memory_space<vmem>>, vector<1x16x128xf32>
    %15 = vector.shape_cast %14 : vector<1x16x128xf32> to vector<16x128xf32>
    %c0_9 = arith.constant 0 : index
    %c0_10 = arith.constant 0 : index
    %16 = vector.load %arg5[%c0_9, %c0_10] : memref<128x128xf32, #tpu.memory_space<vmem>>, vector<128x128xf32>
    %cst_11 = arith.constant dense<0.000000e+00> : vector<16x128xf32>
    %17 = tpu.matmul %15, %16, %cst_11 {dimension_numbers = #tpu.dot_dimension_numbers<[1], [0], [0], [1], [0, 0, 1, 1], [], []>} : vector<16x128xf32>, vector<128x128xf32>, vector<16x128xf32> -> vector<16x128xf32>
    %18 = vector.shape_cast %17 : vector<16x128xf32> to vector<1x16x128xf32>
    %19 = vector.broadcast %13 : vector<1x16x1xf32> to vector<1x16x128xf32>
    %20 = arith.mulf %19, %18 : vector<1x16x128xf32>
    "tpu.trace_start"() <{level = 10 : i32, message = "bnm,bmf->bnf"}> : () -> ()
    %cst_12 = arith.constant dense<0.000000e+00> : vector<1x16x128xf32>
    %21 = tpu.matmul %1, %20, %cst_12 {dimension_numbers = #tpu.dot_dimension_numbers<[2], [1], [1], [2], [0, 0, 0, 1, 1, 2], [0], [0]>} : vector<1x16x16xf32>, vector<1x16x128xf32>, vector<1x16x128xf32> -> vector<1x16x128xf32>
    "tpu.trace_stop"() : () -> ()
    %22 = vector.broadcast %0 : f32 to vector<1x16x128xf32>
    %23 = arith.mulf %22, %21 : vector<1x16x128xf32>
    %cst_13 = arith.constant 1.000000e+00 : f32
    %24 = vector.broadcast %cst_13 : f32 to vector<1x16x128xf32>
    %25 = arith.mulf %24, %20 : vector<1x16x128xf32>
    %26 = arith.addf %23, %25 : vector<1x16x128xf32>
    %27 = vector.broadcast %13 : vector<1x16x1xf32> to vector<1x16x128xf32>
    %28 = arith.mulf %27, %26 : vector<1x16x128xf32>
    %c0_14 = arith.constant 0 : index
    %c0_15 = arith.constant 0 : index
    %29 = vector.load %arg6[%c0_14, %c0_15] : memref<1x128xf32, #tpu.memory_space<vmem>>, vector<1x128xf32>
    %30 = vector.shape_cast %29 : vector<1x128xf32> to vector<1x1x128xf32>
    %31 = vector.broadcast %30 : vector<1x1x128xf32> to vector<1x16x128xf32>
    %32 = arith.addf %28, %31 : vector<1x16x128xf32>
    %c0_16 = arith.constant 0 : index
    %c0_17 = arith.constant 0 : index
    %c0_18 = arith.constant 0 : index
    %33 = vector.load %arg7[%c0_16, %c0_17, %c0_18] : memref<1x16x128xf32, #tpu.memory_space<vmem>>, vector<1x16x128xf32>
    tpu.vector_store %arg7[%c0_16, %c0_17, %c0_18], %32 {strides = array<i32>} : memref<1x16x128xf32, #tpu.memory_space<vmem>>, vector<1x16x128xf32>,
    return
  }
  func.func @transform_0(%arg0: i32, %arg1: i32) -> i32 {
    %c0_i32 = arith.constant 0 : i32
    %c0_i32_0 = arith.constant 0 : i32
    return %c0_i32 : i32
  }
  func.func @transform_1(%arg0: i32, %arg1: i32) -> (i32, i32, i32) {
    %c0_i32 = arith.constant 0 : i32
    %c0_i32_0 = arith.constant 0 : i32
    %c0_i32_1 = arith.constant 0 : i32
    return %arg0, %c0_i32, %c0_i32_0 : i32, i32, i32
  }
  func.func @transform_2(%arg0: i32, %arg1: i32) -> (i32, i32, i32) {
    %c0_i32 = arith.constant 0 : i32
    %c0_i32_0 = arith.constant 0 : i32
    return %arg0, %arg1, %c0_i32 : i32, i32, i32
  }
  func.func @transform_3(%arg0: i32, %arg1: i32) -> (i32, i32) {
    %c0_i32 = arith.constant 0 : i32
    %c0_i32_0 = arith.constant 0 : i32
    %c0_i32_1 = arith.constant 0 : i32
    return %c0_i32, %c0_i32_0 : i32, i32
  }
  func.func @transform_4(%arg0: i32, %arg1: i32) -> (i32, i32) {
    %c0_i32 = arith.constant 0 : i32
    %c0_i32_0 = arith.constant 0 : i32
    %c0_i32_1 = arith.constant 0 : i32
    return %c0_i32, %c0_i32_0 : i32, i32
  }
  func.func @transform_5(%arg0: i32, %arg1: i32) -> (i32, i32, i32) {
    %c0_i32 = arith.constant 0 : i32
    %c0_i32_0 = arith.constant 0 : i32
    return %arg0, %arg1, %c0_i32 : i32, i32, i32
  }
}

</mosaic_0001>

<bundles_post_ra>
// kernel: tpu_custom_call.1
= control target key start
LH: loop header
LB: loop body
LE: loop exit
PB: predicated region body
PF: predicated region fallthrough
CT: control target
= control target key end

     0   :  { %s1140_s0 = inlined_call_operand.<no memory space> [shape: f32[1], index: 0, kind: input, shape index: {}]   ;;  %s1141_s1 = inlined_call_operand.hbm [shape: f32[2,16,128], index: 1, kind: input, shape index: {}]   ;;  %s1142_s2 = inlined_call_operand.hbm [shape: f32[2,16,16], index: 2, kind: input, shape index: {}]   ;;  %s1143_s3 = inlined_call_operand.hbm [shape: f32[128,128], index: 3, kind: input, shape index: {}]   ;;  %s1144_s4 = inlined_call_operand.vmem [shape: f32[1,128], index: 4, kind: input, shape index: {}]   ;;  %s1145_s5 = inlined_call_operand.hbm [shape: f32[2,16,128], index: 5, kind: output, shape index: {}]  }
   0x1   :  { %1152 = sst [smem:[#allocation17_spill]] %s1143_s3 }
   0x2   :  { %10 = sst [smem:[#allocation2]] %s1140_s0 }
   0x3   :  { %11 = vsyncpa [#allocation4], 0 }
   0x4   :  { %13 = vsyncpa [#allocation4 + $0x1], 0 }
   0x5   :  { %14 = vsyncpa [#allocation7], 0 }
   0x6   :  { %16 = vsyncpa [#allocation7 + $0x1], 0 }
   0x7   :  { %17 = vsyncpa [#allocation5], 0 }
   0x8   :  { %19 = vsyncpa [#allocation5 + $0x1], 0  ;;  %s954_s20 = smov 0   ;;  %s956_s21 = smov 0  }
   0x9   :  { %s958_s22 = smov 0   ;;  %s960_s23 = smov 0  }
   0xa   :  { %s962_s24 = smov 0   ;;  %s964_s25 = smov 0  }
   0xb LB: > { %1153 = sst [smem:[#allocation14_spill]] %s909_s24  ;;  %s985_s0 = sadd.s32 4294967295, %s913_s25   ;;  %s913_s25 = sphi %s964_s25, %s25_s25   ;;  %s909_s24 = sphi %s962_s24, %s1166_s24   ;;  %s905_s23 = sphi %s960_s23, %s1165_s23   ;;  %s901_s22 = sphi %s958_s22, %s1169_s22   ;;  %s897_s21 = sphi %s956_s21, %s1168_s21   ;;  %s893_s20 = sphi %s954_s20, %s1167_s20  }
   0xc   : > { %s602_s26 = sadd.s32 4294967294, %s913_s25   ;;  %p78_p0 = scmp.ne.s32.totalorder %s897_s21, %s893_s20 }
   0xd   : > { %p79_p1 = scmp.eq.s32.totalorder %s985_s0, 0  ;;  %p174_p2 = scmp.eq.s32.totalorder %s985_s0, 1 }
   0xe   : > { %p180_p3 = scmp.eq.s32.totalorder %s602_s26, 1  ;;  %p603_p5 = scmp.ge.s32.totalorder %s913_s25, 1 }
   0xf   : > { %p994_p4 = por %p79_p1, %p78_p0  ;;  %p187_p7 = scmp.lt.s32.totalorder %s913_s25, 3 }
  0x10   : > { %p999_p6 = por %p180_p3, %p78_p0  ;;  %s1156_s3 = sld [smem:[#allocation17_spill]] }
  0x11   : > { %p1007_p8 = pnand %p603_p5, %p187_p7  ;;  %s915_s8 = smov [#allocation8]  }
  0x12   : > { %s203_s9 = sshll.u32 %s915_s8, 4  ;;  %p605_p11 = scmp.ge.s32.totalorder %s913_s25, 2  ;;  %s204_s9 = int_to_ptr.vmem [resolvable:$true] %s203_s9 }
  0x13   : > { %p654_p9 = pneg %p1007_p8  ;;  %s1146_s10 = smov 128  }
  0x14   : > { %s1148_s11 = smov 8   ;;  %s37_s12 = sadd.s32 1, %s909_s24 }
  0x15   : > { %p655_p10 = pnand %p654_p9, %p79_p1  ;;  %p39_p12 = scmp.ge.s32.totalorder %s37_s12, 2 }
  0x16   : > { %s201_s6 = sshll.u32 %s1156_s3, 4  ;;  %s65_s13 = sadd.s32 1, %s901_s22  ;;  %s202_s6 = int_to_ptr.hbm [resolvable:$true] %s201_s6 }
  0x17   : > { %657 = dma.hbm_to_vmem [thread:$0]  (!%p655_p10), %s202_s6, 2048, %s204_s9, [#allocation7], %s1146_s10, %s1146_s10, %s1148_s11  }
  0x18   : > { %p72_p13 = scmp.ne.s32.totalorder %s901_s22, %s897_s21  ;;  %p73_p0 = scmp.eq.s32.totalorder %s913_s25, 0 }
  0x19   : > { %s1171_s12 = smov (%p39_p12, %s37_s12), 0  ;;  %p670_p7 = scmp.lt.s32.totalorder %s913_s25, 2 }
  0x1a   : > { %1158 = sst [smem:[#allocation15_spill]] %s1171_s12  ;;  %p1026_p3 = por %p73_p0, %p72_p13 }
  0x1b   : > { %p1032_p5 = por %p174_p2, %p72_p13  ;;  %s62_s16 = ssub.s32 %s909_s24, %s1171_s12 }
  0x1c   : > { %p63_p9 = scmp.eq.s32.totalorder %s62_s16, 0  ;;  %s220_s17 = sand.u32 1, %s901_s22  }
  0x1d   : > { %s606_s18 = sshll.u32 %s220_s17, 4  ;;  %s625_s26 = sshll.u32 %s909_s24, 4 }
  0x1e   : > { %s1041_s19 = scalar_select %p63_p9, %s901_s22, %s65_s13  }
  0x1f   : > { %s229_s6 = scalar_lea.hbm %s1141_s1, %s625_s26  ;;  %s224_s8 = scalar_lea.vmem [#allocation3], %s606_s18 }
  0x20   : > { %1161 = sst [smem:[#allocation16_spill]] %s1041_s19  ;;  %s232_s9 = sshll.u32 %s224_s8, 4  ;;  %s233_s9 = int_to_ptr.vmem [resolvable:$true] %s232_s9 }
  0x21   : > { %s230_s10 = sshll.u32 %s229_s6, 4  ;;  %p659_p2 = pnand %p670_p7, %p1026_p3  ;;  %s231_s10 = int_to_ptr.hbm [resolvable:$true] %s230_s10 }
  0x22   : > { %s253_s16 = scalar_lea.hbm %s1142_s2, %s625_s26  ;;  %s221_s13 = scalar_lea.sflag [#allocation4], %s220_s17 }
  0x23   : > { %s254_s12 = sshll.u32 %s253_s16, 4  ;;  %s1162_s19 = smov 8   ;;  %s255_s12 = int_to_ptr.hbm [resolvable:$true] %s254_s12 }
  0x24   : > { %s1163_s24 = smov 128   ;;  %s246_s29 = scalar_lea.vmem [#allocation6], %s606_s18 }
  0x25   : > { %661 = dma.hbm_to_vmem [thread:$0]  (!%p659_p2), %s231_s10, 256, %s233_s9, %s221_s13, %s1163_s24, %s1163_s24, %s1162_s19  }
  0x26   : > { %s256_s30 = sshll.u32 %s246_s29, 4  ;;  %s242_s8 = sand.u32 1, %s913_s25   ;;  %s257_s30 = int_to_ptr.vmem [resolvable:$true] %s256_s30 }
  0x27   : > { %s243_s6 = scalar_lea.sflag [#allocation7], %s242_s8  ;;  %268 = sbr.rel (%p1007_p8) target bundleno = 492 (0x1ec), region = 40 }
  0x28   : > { %664 = dma.hbm_to_vmem [thread:$0]  (!%p659_p2), %s255_s12, 256, %s257_s30, %s243_s6, %s1163_s24, %s1163_s24, %s1162_s19  }
  0x29   : > { %s1062_s3 = sand.u32 (!%p1007_p8), 1, %s897_s21  }
  0x2a   : > { %s1065_s10 = sshll.u32 (!%p1007_p8), %s1062_s3, 4  ;;  %s271_s11 = scalar_lea.sflag (!%p1007_p8), [#allocation4], %s1062_s3 }
  0x2b   : > { %s274_s14 = scalar_lea.vmem (!%p1007_p8), [#allocation3], %s1065_s10 }
  0x2c   : > { %876 = dma.done.wait (%p994_p4), %s271_s11, 256  }
  0x2d   : > { %878 = vsyncadd (%p994_p4), %s271_s11, 4294967040  ;;  %s280_s24 = sand.u32 1, %s985_s0   ;;  %s284_s12 = scalar_lea.vmem [#allocation6], %s1065_s10 }
  0x2e   : > { %s281_s7 = scalar_lea.sflag [#allocation7], %s280_s24 }
  0x2f   : > { %880 = dma.done.wait (%p994_p4), %s281_s7, 256  }
  0x30   : > { %882 = vsyncadd (%p994_p4), %s281_s7, 4294967040 }
  0x31   : > { %884 = dma.done.wait (%p79_p1), [#allocation7], 2048  }
  0x32   : > { %886 = vsyncadd (%p79_p1), [#allocation7], 4294965248  ;;  %v1083_v0 = vld [vmem:[%s284_s12 + $0x8] sm:$0xff]  ;;  %v1085_v1 = vld [vmem:[%s284_s12] sm:$0xff]  ;;  %vm327_vm0 = vcmask 130048   ;;  %v918_v5 = vmov 1.0   ;;  %v366_v20 = vlaneseq }
  0x33   : > { %v395_v2 = vld [vmem:[#allocation8 + $0x78] sm:$0xff]  ;;  %345 = vmatpush.msra.mxu0 %v1083_v0  ;;  %v394_v3 = vld [vmem:[#allocation8 + $0x70] sm:$0xff]  ;;  %v393_v4 = vld [vmem:[#allocation8 + $0x68] sm:$0xff]  ;;  %s324_s0 = sld [smem:[#allocation2]]  ;;  %s627_s18 = sshll.u32 %s905_s23, 4 }
  0x34   : > { %628 = vmatpush.msra.mxu3 %v395_v2  ;;  %396 = vmatpush.msra.mxu1 %v395_v2  ;;  %v392_v6 = vld [vmem:[#allocation8 + $0x60] sm:$0xff]  ;;  %v391_v7 = vld [vmem:[#allocation8 + $0x58] sm:$0xff]  ;;  %v390_v8 = vld [vmem:[#allocation8 + $0x50] sm:$0xff]  ;;  %v367_v21 = vshrl.u32 %v366_v20, 7  ;;  %s478_s9 = scalar_lea.hbm %s1145_s5, %s627_s18  ;;  %s321_s16 = scalar_lea.vmem [#allocation9], %s1065_s10 }
  0x35   : > { %346 = vmatpush.msra.mxu0 %v1085_v1  ;;  %v389_v9 = vld [vmem:[#allocation8 + $0x48] sm:$0xff]  ;;  %v388_v10 = vld [vmem:[#allocation8 + $0x40] sm:$0xff]  ;;  %v387_v11 = vld [vmem:[#allocation8 + $0x38] sm:$0xff]  ;;  %s479_s13 = sshll.u32 %s321_s16, 4  ;;  %s481_s29 = sshll.u32 %s478_s9, 4  ;;  %s480_s13 = int_to_ptr.vmem [resolvable:$true] %s479_s13  ;;  %s482_s29 = int_to_ptr.hbm [resolvable:$true] %s481_s29 }
  0x36   : > { %629 = vmatpush.msra.mxu3 %v394_v3  ;;  %617 = vmatmul.msk.f32.vlgmr.msra.gmra.mxu0 %vm327_vm0, %v918_v5  ;;  %v386_v12 = vld [vmem:[#allocation8 + $0x30] sm:$0xff]  ;;  %v385_v13 = vld [vmem:[#allocation8 + $0x28] sm:$0xff]  ;;  %v384_v14 = vld [vmem:[#allocation8 + $0x20] sm:$0xff]  ;;  %v374_v22 = vadd.s32 8, %v367_v21  ;;  %s465_s30 = scalar_lea.sflag [#allocation5], %s1062_s3  ;;  %s837_s23 = sshra.s32 %s482_s29, 4  ;;  %s838_s23 = int_to_ptr.hbm [resolvable:$true] %s837_s23 }
  0x37   : > { %397 = vmatpush.msra.mxu1 %v394_v3  ;;  %v383_v15 = vld [vmem:[#allocation8 + $0x18] sm:$0xff]  ;;  %v382_v16 = vld [vmem:[#allocation8 + $0x10] sm:$0xff]  ;;  %v381_v17 = vld [vmem:[#allocation8 + $0x8] sm:$0xff]  ;;  %s839_s8 = scalar_lea.hbm %s838_s23, 16  ;;  %s843_s11 = scalar_lea.hbm %s1145_s5, 32 }
  0x38   : > { %630 = vmatpush.msra.mxu3 %v393_v4  ;;  %v380_v18 = vld [vmem:[#allocation8] sm:$0xff]  ;;  %v379_v19 = vld [vmem:[%s274_s14 + $0x8] sm:$0xff]  ;;  %727 = vset.pattern.permute.xlu0 %v374_v22  ;;  %p840_p1 = scmp.ne.s32.totalorder %s838_s23, %s839_s8  ;;  %p844_p10 = scmp.lt.s32.totalorder %s838_s23, %s1145_s5 }
  0x39   : > { %398 = vmatpush.msra.mxu1 %v393_v4  ;;  %v378_v23 = vld [vmem:[%s274_s14] sm:$0xff]  ;;  %v351_v24 = vstv %s324_s0  ;;  %p845_p12 = scmp.lt.s32.totalorder %s843_s11, %s839_s8 }
  0x3a   : > { %631 = vmatpush.msra.mxu3 %v392_v6  ;;  %v730_v46 = vld [vmem:[%s1144_s4] ss:$0 sm:$0xff]  ;;  %p841_p4 = pnand %p840_p1, %p1032_p5 }
  0x3b   : > { %399 = vmatpush.msra.mxu1 %v392_v6  ;;  %p846_p13 = por %p845_p12, %p844_p10 }
  0x3c   : > { %632 = vmatpush.msra.mxu3 %v391_v7  ;;  %p842_p8 = pneg %p841_p4 }
  0x3d   : > { %400 = vmatpush.msra.mxu1 %v391_v7 }
  0x3e   : > { %633 = vmatpush.msra.mxu3 %v390_v8  ;;  %p847_p0 = pnand %p846_p13, %p842_p8 }
  0x3f   : > { %401 = vmatpush.msra.mxu1 %v390_v8 }
  0x40   : > { %634 = vmatpush.msra.mxu3 %v389_v9 }
  0x41   : > { %402 = vmatpush.msra.mxu1 %v389_v9 }
  0x42   : > { %635 = vmatpush.msra.mxu3 %v388_v10 }
  0x43   : > { %403 = vmatpush.msra.mxu1 %v388_v10 }
  0x44   : > { %636 = vmatpush.msra.mxu3 %v387_v11 }
  0x45   : > { %404 = vmatpush.msra.mxu1 %v387_v11 }
  0x46   : > { %637 = vmatpush.msra.mxu3 %v386_v12 }
  0x47   : > { %405 = vmatpush.msra.mxu1 %v386_v12 }
  0x48   : > { %638 = vmatpush.msra.mxu3 %v385_v13 }
  0x49   : > { %406 = vmatpush.msra.mxu1 %v385_v13 }
  0x4a   : > { %639 = vmatpush.msra.mxu3 %v384_v14 }
  0x4b   : > { %407 = vmatpush.msra.mxu1 %v384_v14 }
  0x4c   : > { %640 = vmatpush.msra.mxu3 %v383_v15 }
  0x4d   : > { %408 = vmatpush.msra.mxu1 %v383_v15 }
  0x4e   : > { %641 = vmatpush.msra.mxu3 %v382_v16 }
  0x4f   : > { %409 = vmatpush.msra.mxu1 %v382_v16 }
  0x50   : > { %642 = vmatpush.msra.mxu3 %v381_v17 }
  0x51   : > { %410 = vmatpush.msra.mxu1 %v381_v17 }
  0x52   : > { %643 = vmatpush.msra.mxu3 %v380_v18 }
  0x53   : > { %411 = vmatpush.msra.mxu1 %v380_v18  ;;  %415 = vmatmul.f32.vlgmr.msra.gmra.mxu3 %v379_v19 }
  0x54   : > { %412 = vmatmul.f32.vlgmr.msra.gmra.mxu1 %v378_v23 }
  0xb3   : > { %v348_v25 = vpop.f32.mrf.mxu0 }
  0xb4   : > { %v352_v26 = vmul.f32 %v351_v24, %v348_v25 }
  0xb6   : > { %v353_v27 = vadd.f32 1.0, %v352_v26 }
  0xb8   : > { %v354_v28 = vadd.f32 1e-05, %v353_v27 }
  0xba   : > { %731 = vrsqrt.f32 %v354_v28  ;;  %vm361_vm2 = vweird.f32 %v354_v28 }
  0xc0   : > { %v732_v29 = vpop.eup %731 }
  0xc1   : > { %v356_v30 = vmul.f32 %v732_v29, %v354_v28  ;;  %vm362_vm1 = vweird.f32 %v732_v29 }
  0xc2   : > { %vm363_vm3 = vmor %vm361_vm2, %vm362_vm1 }
  0xc3   : > { %v357_v31 = vmul.f32 %v732_v29, %v356_v30 }
  0xc5   : > { %v358_v32 = vmul.f32 0.5, %v357_v31 }
  0xc7   : > { %v359_v33 = vsub.f32 1.5, %v358_v32 }
  0xc9   : > { %v360_v34 = vmul.f32 %v732_v29, %v359_v33 }
  0xcb   : > { %v364_v35 = vsel %vm363_vm3, %v732_v29, %v360_v34 }
  0xcc   : > { %v365_v36 = vperm.slane %v364_v35, 0 }
  0xce   : > { %376 = vperm.xlu0 %727, %v365_v36  }
  0xd1   : > { %v413_v40 = vpop.f32.mrf.mxu1 }
  0xd6   : > { %728 = vset.pattern.permute.xlu0 %v367_v21  ;;  %v416_v37 = vpop.f32.mrf.mxu3 }
  0xde   : > { %370 = vperm.xlu0 %728, %v365_v36  }
  0xe6   : > { %729 = vset.pattern.permute.xlu0 %v374_v22 }
 0x140   : > { %v377_v38 = vpop.permute.xlu0 %376 }
 0x141   : > { %v420_v39 = vmul.f32 %v416_v37, %v377_v38 }
 0x143   : > { %441 = vmatpush.msra.mxu2 %v420_v39 }
 0x150   : > { %v371_v41 = vpop.permute.xlu0 %370 }
 0x151   : > { %v419_v42 = vmul.f32 %v413_v40, %v371_v41 }
 0x153   : > { %442 = vmatpush.msra.mxu2 %v419_v42 }
 0x154   : > { %618 = vmatmul.msk.f32.vlgmr.msra.gmra.mxu2 %vm327_vm0, %v1085_v1 }
 0x15c   : > { %619 = vmatmul.msk.f32.gmra.mxu2 %vm327_vm0, %v1083_v0 }
 0x1d7   : > { %v444_v43 = vpop.f32.mrf.mxu2 }
 0x1d8   : > { %v450_v44 = vmul.f32 %v444_v43, %v351_v24 }
 0x1da   : > { %v452_v45 = vadd.f32 %v450_v44, %v419_v42 }
 0x1dc   : > { %v454_v47 = vmul.f32 %v452_v45, %v371_v41 }
 0x1de   : > { %v460_v48 = vadd.f32 %v730_v46, %v454_v47 }
 0x1df   : > { %v447_v49 = vpop.f32.mrf.mxu2 }
 0x1e0   : > { %462 = vst [vmem:[%s321_s16] sm:$0xff] %v460_v48  ;;  %v451_v50 = vmul.f32 %v447_v49, %v351_v24 }
 0x1e2   : > { %v453_v51 = vadd.f32 %v451_v50, %v420_v39 }
 0x1e4   : > { %v455_v52 = vmul.f32 %v453_v51, %v377_v38 }
 0x1e6   : > { %v461_v53 = vadd.f32 %v730_v46, %v455_v52 }
 0x1e8   : > { %463 = vst [vmem:[%s321_s16 + $0x8] sm:$0xff] %v461_v53 }
 0x1e9   : > { %850 = shalt.err (!%p847_p0)
}
 0x1ea   : > { %s919_s3 = smov 128   ;;  %s920_s7 = smov 8  }
 0x1eb   : > { %652 = dma.vmem_to_hbm [thread:$0]  (%p1032_p5), %s480_s13, 256, %s482_s29, %s465_s30, %s919_s3, %s919_s3, %s920_s7  }
 0x1ec PF: > { %s496_s12 = sand.u32 1, %s893_s20   ;;  %p666_p3 = pnand %p605_p11, %p999_p6 }
 0x1ed   : > { %s497_s0 = scalar_lea.sflag [#allocation5], %s496_s12 }
 0x1ee   : > { %p667_p7 = pneg %p666_p3 }
 0x1f0   : > { %888 = dma.done.wait (%p667_p7), %s497_s0, 256  }
 0x1f1   : > { %890 = vsyncadd (%p667_p7), %s497_s0, 4294967040  ;;  %s25_s25 = sadd.s32 1, %s913_s25   ;;  %s1164_s27 = sld [smem:[#allocation16_spill]] }
 0x1f2   : > { %p22_p9 = scmp.ge.s32.totalorder %s25_s25, 4   ;;  %s1165_s23 = sld [smem:[#allocation14_spill]] }
 0x1f3   : > { %s1166_s24 = sld [smem:[#allocation15_spill]]  ;;  %s1167_s20 = smov %s897_s21 }
 0x1f4   : > { %s1168_s21 = smov %s901_s22  ;;  %24 = sbr.rel (!%p22_p9) target bundleno = 11 (0xb), region = 102 }
 0x1f7   : > { %s1169_s22 = smov %s1164_s27 }
 0x1f9   :  { %503 = vsyncpa [#allocation4], 1 }
 0x1fa   :  { %505 = vsyncpa [#allocation4 + $0x1], 1 }
 0x1fb   :  { %506 = vsyncpa [#allocation7], 1 }
 0x1fc   :  { %508 = vsyncpa [#allocation7 + $0x1], 1 }
 0x1fd   :  { %509 = vsyncpa [#allocation5], 1 }
 0x1fe   :  { %511 = vsyncpa [#allocation5 + $0x1], 1 }

</bundles_post_ra>
